<compile_context>
chip_gen: v5e
topology: v5e:2x2
jax: 0.10.0
libtpu: 0.0.40
codegen_flags: <defaults>
</compile_context>

<pallas_src>
import functools

import jax
import jax.numpy as jnp
from jax.experimental import pallas as pl
from jax.experimental.pallas import tpu as pltpu


def attblock_kernel(x_ref, w_ref, b_ref, sum_ref, att_ref, cla_ref, *,
                    B, T, Cin, Cout, activation):
    """One batch tile.

    x_ref   : (B, T, Cin)     bf16, features on the lane axis
    w_ref   : (Cin, 2*Cout)   bf16, [att | cla] output channels packed on lanes
    b_ref   : (1, 2*Cout)     f32 packed biases
    sum_ref : (B, 1, Cout)    f32 attention-pooled output
    att_ref : (B, T, Cout)    f32 softmax attention weights
    cla_ref : (B, T, Cout)    f32 (activated) classification values
    """
    # ---- single fused MXU matmul for both 1x1 convs ----
    xm = x_ref[...].reshape(B * T, Cin)                       # leading-dim merge, no relayout
    y = jnp.dot(xm, w_ref[...], preferred_element_type=jnp.float32)
    y = y + b_ref[...]                                        # f32 bias add (VPU)
    y = y.reshape(B, T, 2 * Cout)

    att_logits = jnp.tanh(y[:, :, :Cout])                     # EUP
    cla_raw = y[:, :, Cout:]

    # ---- softmax over the time axis (axis=1), numerically stable ----
    m = jnp.max(att_logits, axis=1, keepdims=True)
    e = jnp.exp(att_logits - m)                               # EUP
    s = jnp.sum(e, axis=1, keepdims=True)
    norm_att = e / s

    # ---- nonlinear_transform on the cla head ----
    if activation == 'linear':
        cla = cla_raw
    elif activation == 'sigmoid':
        cla = jax.nn.sigmoid(cla_raw)
    else:
        raise ValueError('Incorrect argument!')

    # ---- attention-weighted sum over time ----
    pooled = jnp.sum(norm_att * cla, axis=1, keepdims=True)   # (B, 1, Cout)

    sum_ref[...] = pooled.astype(sum_ref.dtype)
    att_ref[...] = norm_att.astype(att_ref.dtype)
    cla_ref[...] = cla.astype(cla_ref.dtype)


def att_block_forward(x_nct, w_att, b_att, w_cla, b_cla, activation='linear',
                      batch_tile=2):
    """Wrapper matching the PyTorch module.

    x_nct : (N, in_features, T)  -> returns (out (N, Cout),
                                             norm_att (N, Cout, T),
                                             cla (N, Cout, T))
    """
    N, Cin, T = x_nct.shape
    Cout = w_att.shape[0]
    B = batch_tile if (N % batch_tile == 0) else 1

    # layout plumbing in the wrapper (cheap XLA ops):
    #   contraction dim (Cin) on lanes for the input,
    #   packed [att | cla] output channels on lanes for the weights.
    x_ntc = jnp.transpose(x_nct, (0, 2, 1)).astype(jnp.bfloat16)          # (N, T, Cin)
    w_both = jnp.concatenate([w_att.T, w_cla.T], axis=1).astype(jnp.bfloat16)  # (Cin, 2*Cout)
    b_both = jnp.concatenate([b_att, b_cla]).reshape(1, 2 * Cout).astype(jnp.float32)

    kernel = functools.partial(attblock_kernel, B=B, T=T, Cin=Cin, Cout=Cout,
                               activation=activation)

    flops = 2 * N * T * Cin * (2 * Cout) + 12 * N * T * Cout
    transcendentals = (3 if activation == 'sigmoid' else 2) * N * T * Cout
    bytes_accessed = (x_ntc.size * 2 + w_both.size * 2 + b_both.size * 4
                      + N * Cout * 4 + 2 * N * T * Cout * 4)

    out_sum, norm_att_ntc, cla_ntc = pl.pallas_call(
        kernel,
        out_shape=(
            jax.ShapeDtypeStruct((N, 1, Cout), jnp.float32),
            jax.ShapeDtypeStruct((N, T, Cout), jnp.float32),
            jax.ShapeDtypeStruct((N, T, Cout), jnp.float32),
        ),
        grid_spec=pltpu.PrefetchScalarGridSpec(
            num_scalar_prefetch=0,
            grid=(N // B,),
            in_specs=[
                pl.BlockSpec((B, T, Cin), lambda n: (n, 0, 0)),
                pl.BlockSpec((Cin, 2 * Cout), lambda n: (0, 0)),
                pl.BlockSpec((1, 2 * Cout), lambda n: (0, 0)),
            ],
            out_specs=[
                pl.BlockSpec((B, 1, Cout), lambda n: (n, 0, 0)),
                pl.BlockSpec((B, T, Cout), lambda n: (n, 0, 0)),
                pl.BlockSpec((B, T, Cout), lambda n: (n, 0, 0)),
            ],
        ),
        compiler_params=pltpu.CompilerParams(
            dimension_semantics=("parallel",)),
        cost_estimate=pl.CostEstimate(flops=flops,
                                      transcendentals=transcendentals,
                                      bytes_accessed=bytes_accessed),
    )(x_ntc, w_both, b_both)

    # back to PyTorch layouts
    x_out = out_sum[:, 0, :]                              # (N, Cout)
    norm_att = jnp.transpose(norm_att_ntc, (0, 2, 1))     # (N, Cout, T)
    cla = jnp.transpose(cla_ntc, (0, 2, 1))               # (N, Cout, T)
    return x_out, norm_att, cla


def reference_forward(x_nct, w_att, b_att, w_cla, b_cla, activation='linear'):
    """Pure-JAX reference (same bf16-in / f32-accumulate matmul semantics)."""
    xb = x_nct.astype(jnp.bfloat16)
    wa = w_att.astype(jnp.bfloat16)
    wc = w_cla.astype(jnp.bfloat16)
    att = jnp.einsum('oc,nct->not', wa, xb,
                     preferred_element_type=jnp.float32) + b_att[None, :, None]
    cla = jnp.einsum('oc,nct->not', wc, xb,
                     preferred_element_type=jnp.float32) + b_cla[None, :, None]
    norm_att = jax.nn.softmax(jnp.tanh(att), axis=-1)
    if activation == 'sigmoid':
        cla = jax.nn.sigmoid(cla)
    x_out = jnp.sum(norm_att * cla, axis=2)
    return x_out, norm_att, cla


if __name__ == "__main__":
    # Small deterministic example: batch=8, in_features=32, out_features=8, seq=16.
    N, Cin, Cout, T = 8, 32, 8, 16
    key = jax.random.PRNGKey(0)
    kx, ka, kb, kc, kd = jax.random.split(key, 5)

    x = jax.random.normal(kx, (N, Cin, T), jnp.float32)

    # Conv1d(kernel_size=1) weights + biases, Xavier-style scale (init_layer).
    w_att = jax.random.normal(ka, (Cout, Cin), jnp.float32) * ((2.0 / (Cin + Cout)) ** 0.5)
    b_att = jax.random.normal(kb, (Cout,), jnp.float32) * 0.1
    w_cla = jax.random.normal(kc, (Cout, Cin), jnp.float32) * ((2.0 / (Cin + Cout)) ** 0.5)
    b_cla = jax.random.normal(kd, (Cout,), jnp.float32) * 0.1

    for activation in ('linear', 'sigmoid'):
        out, natt, cla = att_block_forward(x, w_att, b_att, w_cla, b_cla,
                                           activation=activation)
        out = jax.block_until_ready(out)

        r_out, r_natt, r_cla = reference_forward(x, w_att, b_att, w_cla, b_cla,
                                                 activation=activation)
        assert out.shape == (N, Cout), out.shape
        assert natt.shape == (N, Cout, T), natt.shape
        assert cla.shape == (N, Cout, T), cla.shape
        assert jnp.allclose(out, r_out, atol=2e-3, rtol=2e-3), f"out mismatch ({activation})"
        assert jnp.allclose(natt, r_natt, atol=2e-3, rtol=2e-3), f"norm_att mismatch ({activation})"
        assert jnp.allclose(cla, r_cla, atol=2e-3, rtol=2e-3), f"cla mismatch ({activation})"

    print("KERNEL_OK")
</pallas_src>

<mosaic_0001>
module attributes {stable_mosaic.version = 11 : i64} {
  func.func @attblock_kernel(%arg0: i32, %arg1: memref<2x16x32xbf16, #tpu.memory_space<vmem>>, %arg2: memref<32x16xbf16, #tpu.memory_space<vmem>>, %arg3: memref<1x16xf32, #tpu.memory_space<vmem>>, %arg4: memref<2x1x8xf32, #tpu.memory_space<vmem>>, %arg5: memref<2x16x8xf32, #tpu.memory_space<vmem>>, %arg6: memref<2x16x8xf32, #tpu.memory_space<vmem>>) attributes {dimension_semantics = [#tpu.dimension_semantics<parallel>], iteration_bounds = array<i64: 4>, scalar_prefetch = 0 : i64, scratch_operands = 0 : i64, tpu.core_type = #tpu.core_type<tc>, window_params = [{transform_indices = @transform_0, window_bounds = array<i64: 2, 16, 32>}, {pipeline_mode = #tpu.pipeline_mode<synchronous>, transform_indices = @transform_1, window_bounds = array<i64: 32, 16>}, {pipeline_mode = #tpu.pipeline_mode<synchronous>, transform_indices = @transform_2, window_bounds = array<i64: 1, 16>}, {transform_indices = @transform_3, window_bounds = array<i64: 2, 1, 8>}, {transform_indices = @transform_4, window_bounds = array<i64: 2, 16, 8>}, {transform_indices = @transform_5, window_bounds = array<i64: 2, 16, 8>}]} {
    %c0 = arith.constant 0 : index
    %c0_0 = arith.constant 0 : index
    %c0_1 = arith.constant 0 : index
    %0 = vector.load %arg1[%c0, %c0_0, %c0_1] : memref<2x16x32xbf16, #tpu.memory_space<vmem>>, vector<2x16x32xbf16>
    %1 = vector.shape_cast %0 : vector<2x16x32xbf16> to vector<32x32xbf16>
    %c0_2 = arith.constant 0 : index
    %c0_3 = arith.constant 0 : index
    %2 = vector.load %arg2[%c0_2, %c0_3] : memref<32x16xbf16, #tpu.memory_space<vmem>>, vector<32x16xbf16>
    %cst = arith.constant dense<0.000000e+00> : vector<32x16xf32>
    %3 = tpu.matmul %1, %2, %cst {dimension_numbers = #tpu.dot_dimension_numbers<[1], [0], [0], [1], [0, 0, 1, 1], [], []>} : vector<32x32xbf16>, vector<32x16xbf16>, vector<32x16xf32> -> vector<32x16xf32>
    %c0_4 = arith.constant 0 : index
    %c0_5 = arith.constant 0 : index
    %4 = vector.load %arg3[%c0_4, %c0_5] : memref<1x16xf32, #tpu.memory_space<vmem>>, vector<1x16xf32>
    %5 = vector.broadcast %4 : vector<1x16xf32> to vector<32x16xf32>
    %6 = arith.addf %3, %5 : vector<32x16xf32>
    %7 = vector.shape_cast %6 : vector<32x16xf32> to vector<2x16x16xf32>
    %8 = vector.extract_strided_slice %7 {offsets = [0, 0, 0], sizes = [2, 16, 8], strides = [1, 1, 1]} : vector<2x16x16xf32> to vector<2x16x8xf32>
    %9 = math.tanh %8 : vector<2x16x8xf32>
    %10 = vector.extract_strided_slice %7 {offsets = [0, 0, 8], sizes = [2, 16, 8], strides = [1, 1, 1]} : vector<2x16x16xf32> to vector<2x16x8xf32>
    %cst_6 = arith.constant dense<0xFF800000> : vector<2x8xf32>
    %11 = vector.multi_reduction <maximumf>, %9, %cst_6 [1] : vector<2x16x8xf32> to vector<2x8xf32>
    %12 = vector.shape_cast %11 : vector<2x8xf32> to vector<2x1x8xf32>
    %13 = vector.broadcast %12 : vector<2x1x8xf32> to vector<2x16x8xf32>
    %14 = arith.subf %9, %13 : vector<2x16x8xf32>
    %15 = math.exp %14 : vector<2x16x8xf32>
    %cst_7 = arith.constant dense<0.000000e+00> : vector<2x8xf32>
    %16 = vector.multi_reduction <add>, %15, %cst_7 [1] : vector<2x16x8xf32> to vector<2x8xf32>
    %17 = vector.shape_cast %16 : vector<2x8xf32> to vector<2x1x8xf32>
    %18 = vector.broadcast %17 : vector<2x1x8xf32> to vector<2x16x8xf32>
    %19 = arith.divf %15, %18 : vector<2x16x8xf32>
    %20 = arith.mulf %19, %10 : vector<2x16x8xf32>
    %cst_8 = arith.constant dense<0.000000e+00> : vector<2x8xf32>
    %21 = vector.multi_reduction <add>, %20, %cst_8 [1] : vector<2x16x8xf32> to vector<2x8xf32>
    %22 = vector.shape_cast %21 : vector<2x8xf32> to vector<2x1x8xf32>
    %c0_9 = arith.constant 0 : index
    %c0_10 = arith.constant 0 : index
    %c0_11 = arith.constant 0 : index
    %23 = vector.load %arg4[%c0_9, %c0_10, %c0_11] : memref<2x1x8xf32, #tpu.memory_space<vmem>>, vector<2x1x8xf32>
    tpu.vector_store %arg4[%c0_9, %c0_10, %c0_11], %22 {strides = array<i32>} : memref<2x1x8xf32, #tpu.memory_space<vmem>>, vector<2x1x8xf32>,
    %c0_12 = arith.constant 0 : index
    %c0_13 = arith.constant 0 : index
    %c0_14 = arith.constant 0 : index
    %24 = vector.load %arg5[%c0_12, %c0_13, %c0_14] : memref<2x16x8xf32, #tpu.memory_space<vmem>>, vector<2x16x8xf32>
    tpu.vector_store %arg5[%c0_12, %c0_13, %c0_14], %19 {strides = array<i32>} : memref<2x16x8xf32, #tpu.memory_space<vmem>>, vector<2x16x8xf32>,
    %c0_15 = arith.constant 0 : index
    %c0_16 = arith.constant 0 : index
    %c0_17 = arith.constant 0 : index
    %25 = vector.load %arg6[%c0_15, %c0_16, %c0_17] : memref<2x16x8xf32, #tpu.memory_space<vmem>>, vector<2x16x8xf32>
    tpu.vector_store %arg6[%c0_15, %c0_16, %c0_17], %10 {strides = array<i32>} : memref<2x16x8xf32, #tpu.memory_space<vmem>>, vector<2x16x8xf32>,
    return
  }
  func.func @transform_0(%arg0: i32) -> (i32, i32, i32) {
    %c0_i32 = arith.constant 0 : i32
    %c0_i32_0 = arith.constant 0 : i32
    %c0_i32_1 = arith.constant 0 : i32
    return %arg0, %c0_i32, %c0_i32_0 : i32, i32, i32
  }
  func.func @transform_1(%arg0: i32) -> (i32, i32) {
    %c0_i32 = arith.constant 0 : i32
    %c0_i32_0 = arith.constant 0 : i32
    %c0_i32_1 = arith.constant 0 : i32
    return %c0_i32, %c0_i32_0 : i32, i32
  }
  func.func @transform_2(%arg0: i32) -> (i32, i32) {
    %c0_i32 = arith.constant 0 : i32
    %c0_i32_0 = arith.constant 0 : i32
    %c0_i32_1 = arith.constant 0 : i32
    return %c0_i32, %c0_i32_0 : i32, i32
  }
  func.func @transform_3(%arg0: i32) -> (i32, i32, i32) {
    %c0_i32 = arith.constant 0 : i32
    %c0_i32_0 = arith.constant 0 : i32
    %c0_i32_1 = arith.constant 0 : i32
    return %arg0, %c0_i32, %c0_i32_0 : i32, i32, i32
  }
  func.func @transform_4(%arg0: i32) -> (i32, i32, i32) {
    %c0_i32 = arith.constant 0 : i32
    %c0_i32_0 = arith.constant 0 : i32
    %c0_i32_1 = arith.constant 0 : i32
    return %arg0, %c0_i32, %c0_i32_0 : i32, i32, i32
  }
  func.func @transform_5(%arg0: i32) -> (i32, i32, i32) {
    %c0_i32 = arith.constant 0 : i32
    %c0_i32_0 = arith.constant 0 : i32
    %c0_i32_1 = arith.constant 0 : i32
    return %arg0, %c0_i32, %c0_i32_0 : i32, i32, i32
  }
}

</mosaic_0001>

<bundles_post_ra>
// kernel: tpu_custom_call.1
= control target key start
LH: loop header
LB: loop body
LE: loop exit
PB: predicated region body
PF: predicated region fallthrough
CT: control target
= control target key end

     0   :  { %11 = vsyncpa [#allocation3], 0  ;;  %s1059_s0 = inlined_call_operand.hbm [shape: bf16[8,16,32], index: 0, kind: input, shape index: {}]   ;;  %s1060_s1 = inlined_call_operand.vmem [shape: bf16[32,16], index: 1, kind: input, shape index: {}]   ;;  %s1061_s2 = inlined_call_operand.vmem [shape: f32[1,16], index: 2, kind: input, shape index: {}]   ;;  %s1062_s3 = inlined_call_operand.hbm [shape: f32[8,1,8], index: 3, kind: output, shape index: {0}]   ;;  %s1063_s4 = inlined_call_operand.vmem [shape: f32[8,16,8], index: 4, kind: output, shape index: {1}]   ;;  %s1064_s5 = inlined_call_operand.vmem [shape: f32[8,16,8], index: 5, kind: output, shape index: {2}]  }
   0x1   :  { %13 = vsyncpa [#allocation3 + $0x1], 0 }
   0x2   :  { %14 = vsyncpa [#allocation4], 0 }
   0x3   :  { %16 = vsyncpa [#allocation4 + $0x1], 0  ;;  %s887_s18 = smov 0   ;;  %s889_s19 = smov 0  }
   0x4   :  { %s891_s20 = smov 0   ;;  %s893_s21 = smov 0  }
   0x5 LB: > { %s908_s22 = sadd.s32 4294967295, %s850_s21   ;;  %s634_s23 = sadd.s32 4294967294, %s850_s21   ;;  %s850_s21 = sphi %s893_s21, %s1073_s21   ;;  %s846_s20 = sphi %s891_s20, %s1072_s20   ;;  %s842_s19 = sphi %s889_s19, %s1071_s19   ;;  %s838_s18 = sphi %s887_s18, %s1070_s18  }
   0x6   : > { %s912_s24 = sadd.s32 1, %s850_s21   ;;  %s29_s25 = sadd.s32 1, %s846_s20 }
   0x7   : > { %s26_s26 = ssub.s32 %s850_s21, %s912_s24  ;;  %p36_p0 = scmp.ne.s32.totalorder %s846_s20, %s842_s19 }
   0x8   : > { %p27_p1 = scmp.eq.s32.totalorder %s26_s26, 0  ;;  %p37_p2 = scmp.eq.s32.totalorder %s850_s21, 0 }
   0x9   : > { %p42_p3 = scmp.ne.s32.totalorder %s842_s19, %s838_s18  ;;  %p43_p4 = scmp.eq.s32.totalorder %s908_s22, 0 }
   0xa   : > { %s924_s27 = scalar_select %p27_p1, %s846_s20, %s29_s25  }
   0xb   : > { %p926_p5 = por %p37_p2, %p36_p0  ;;  %p930_p6 = por %p43_p4, %p42_p3 }
   0xc   : > { %p108_p7 = scmp.eq.s32.totalorder %s908_s22, 3  ;;  %p114_p8 = scmp.eq.s32.totalorder %s634_s23, 3 }
   0xd   : > { %p694_p9 = scmp.lt.s32.totalorder %s850_s21, 4  ;;  %s192_s7 = sand.u32 1, %s846_s20  }
   0xe   : > { %p936_p10 = por %p108_p7, %p36_p0  ;;  %p940_p11 = por %p114_p8, %p42_p3 }
   0xf   : > { %s673_s8 = sshll.u32 %s850_s21, 4  ;;  %s637_s9 = sshll.u32 %s192_s7, 4 }
  0x10   : > { %s202_s12 = scalar_lea.hbm %s1059_s0, %s673_s8  ;;  %s196_s14 = scalar_lea.vmem [#allocation2], %s637_s9 }
  0x11   : > { %s203_s13 = sshll.u32 %s202_s12, 4  ;;  %s205_s15 = sshll.u32 %s196_s14, 4  ;;  %s204_s13 = int_to_ptr.hbm [resolvable:$true] %s203_s13  ;;  %s206_s15 = int_to_ptr.vmem [resolvable:$true] %s205_s15 }
  0x12   : > { %p951_p12 = pnand %p694_p9, %p926_p5  ;;  %p641_p13 = scmp.ge.s32.totalorder %s850_s21, 1 }
  0x13   : > { %p213_p0 = scmp.lt.s32.totalorder %s850_s21, 5  ;;  %s193_s17 = scalar_lea.sflag [#allocation3], %s192_s7 }
  0x14   : > { %s754_s23 = sshra.s32 %s204_s13, 4  ;;  %p758_p2 = pneg %p951_p12  ;;  %s755_s23 = int_to_ptr.hbm [resolvable:$true] %s754_s23 }
  0x15   : > { %s756_s25 = scalar_lea.hbm %s755_s23, 16  ;;  %s761_s28 = scalar_lea.hbm %s1059_s0, 64 }
  0x16   : > { %p757_p1 = scmp.ne.s32.totalorder %s755_s23, %s756_s25  ;;  %p762_p5 = scmp.lt.s32.totalorder %s755_s23, %s1059_s0 }
  0x17   : > { %p763_p7 = scmp.lt.s32.totalorder %s761_s28, %s756_s25 }
  0x18   : > { %p759_p3 = pnand %p758_p2, %p757_p1 }
  0x19   : > { %p764_p8 = por %p763_p7, %p762_p5 }
  0x1a   : > { %p760_p4 = pneg %p759_p3 }
  0x1c   : > { %p765_p9 = pnand %p764_p8, %p760_p4 }
  0x1e   : > { %768 = shalt.err (!%p765_p9)
}
  0x1f   : > { %s852_s7 = smov 64   ;;  %s853_s11 = smov 4  }
  0x20   : > { %689 = dma.hbm_to_vmem [thread:$0]  (!%p951_p12), %s204_s13, 256, %s206_s15, %s193_s17, %s852_s7, %s852_s7, %s853_s11  }
  0x21   : > { %p214_p1 = pnand %p641_p13, %p213_p0 }
  0x22   : > { %s972_s12 = sand.u32 (!%p214_p1), 1, %s842_s19  }
  0x23   : > { %217 = sbr.rel (%p214_p1) target bundleno = 322 (0x142), region = 32  ;;  %s642_s14 = sshll.u32 (!%p214_p1), %s972_s12, 4 }
  0x24   : > { %s220_s23 = scalar_lea.sflag (!%p214_p1), [#allocation3], %s972_s12  ;;  %s223_s25 = scalar_lea.vmem (!%p214_p1), [#allocation2], %s642_s14 }
  0x28   : > { %829 = dma.done.wait (%p930_p6), %s220_s23, 256  }
  0x29   : > { %831 = vsyncadd (%p930_p6), %s220_s23, 4294967040  ;;  %v679_v0 = vld [vmem:[%s1060_s1 + $0x8] sm:$0xff]  ;;  %v678_v1 = vld [vmem:[%s1060_s1] sm:$0xff]  ;;  %vm314_vm0 = vcmask 261120   ;;  %s854_s8 = smov 120   ;;  %vm344_vm1 = vcmask 64512  }
  0x2a   : > { %327 = vmatpush.bf16.msra.mxu0 %v679_v0  ;;  %680 = vmatpush.bf16.msra.mxu1 %v679_v0  ;;  %v676_v2 = vld [vmem:[%s223_s25] sm:$0xff]  ;;  %v677_v3 = vld [vmem:[%s223_s25 + $0x8] sm:$0xff]  ;;  %s998_s28 = sshll.u32 %s908_s22, 1  ;;  %s643_s16 = sshll.u32 %s972_s12, 1  ;;  %vm463_vm10 = vcmask 57344  }
  0x2b   : > { %v733_v4 = vld [vmem:[%s1061_s2] ss:$0 sm:$0xff]  ;;  %p266_p6 = scmp.lt.s32.totalorder %s998_s28, 7  ;;  %s497_s17 = scalar_lea.hbm %s1062_s3, %s998_s28 }
  0x2c   : > { %s1028_s26 = sshll.u32 %s497_s17, 4  ;;  %s246_s29 = scalar_lea.vmem [#allocation5], %s643_s16  ;;  %s501_s26 = int_to_ptr.hbm [resolvable:$true] %s1028_s26 }
  0x2d   : > { %s1002_s9 = scalar_select %p266_p6, %s998_s28, 7 }
  0x2e   : > { %328 = vmatpush.bf16.msra.mxu0 %v678_v1  ;;  %681 = vmatpush.bf16.msra.mxu1 %v678_v1  ;;  %s475_s28 = scalar_lea.sflag [#allocation4], %s972_s12 }
  0x2f   : > { %s674_s22 = sshll.u32 %s1002_s9, 4  ;;  %s798_s9 = sshra.s32 %s501_s26, 4  ;;  %s799_s9 = int_to_ptr.hbm [resolvable:$true] %s798_s9 }
  0x30   : > { %s270_s11 = scalar_lea.vmem %s1063_s4, %s674_s22  ;;  %s277_s25 = scalar_lea.vmem %s1064_s5, %s674_s22 }
  0x31   : > { %666 = vmatmul.msk.bf16.vlgmr.msra.gmra.mxu0 %vm314_vm0, %v676_v2  ;;  %667 = vmatmul.msk.bf16.vlgmr.msra.gmra.mxu1 %vm314_vm0, %v677_v3  ;;  %s800_s22 = scalar_lea.hbm %s799_s9, 2  ;;  %p805_p2 = scmp.lt.s32.totalorder %s799_s9, %s1062_s3 }
  0x32   : > { %p801_p12 = scmp.ne.s32.totalorder %s799_s9, %s800_s22 }
  0x34   : > { %p802_p13 = pnand %p801_p12, %p936_p10 }
  0x36   : > { %p803_p0 = pneg %p802_p13 }
  0xae   : > { %v330_v5 = vpop.f32.mrf.mxu0  ;;  %v335_v6 = vpop.f32.mrf.mxu1 }
  0xaf   : > { %v331_v7 = vadd.f32 %v733_v4, %v330_v5  ;;  %v336_v8 = vadd.f32 %v733_v4, %v335_v6 }
  0xb1   : > { %433 = vrot.lane.b32.xlu1 %v336_v8, %s854_s8  ;;  %429 = vrot.lane.b32.xlu0 %v331_v7, %s854_s8  ;;  %734 = vtanh.f32 %v331_v7 }
  0xb2   : > { %736 = vtanh.f32 %v336_v8 }
  0xb6   : > { %v332_v9 = vpop.f32.mrf.mxu0  ;;  %v337_v10 = vpop.f32.mrf.mxu1 }
  0xb7   : > { %v333_v11 = vadd.f32 %v733_v4, %v332_v9  ;;  %v338_v12 = vadd.f32 %v733_v4, %v337_v10  ;;  %v735_v13 = vpop.eup %734 }
  0xb8   : > { %v737_v14 = vpop.eup %736  ;;  %v345_v17 = vsel %vm344_vm1, %v735_v13, -inf }
  0xb9   : > { %738 = vtanh.f32 %v333_v11  ;;  %435 = vrot.lane.b32.xlu1 %v338_v12, %s854_s8  ;;  %431 = vrot.lane.b32.xlu0 %v333_v11, %s854_s8  ;;  %v354_v19 = vsel %vm344_vm1, %v737_v14, -inf  ;;  %s498_s8 = sshll.u32 %s246_s29, 4  ;;  %s499_s8 = int_to_ptr.vmem [resolvable:$true] %s498_s8 }
  0xba   : > { %740 = vtanh.f32 %v338_v12 }
  0xbf   : > { %v739_v15 = vpop.eup %738 }
  0xc0   : > { %v741_v16 = vpop.eup %740  ;;  %v346_v18 = vsel %vm344_vm1, %v739_v15, -inf }
  0xc1   : > { %v347_v20 = vmax.f32 %v345_v17, %v346_v18  ;;  %v355_v21 = vsel %vm344_vm1, %v741_v16, -inf }
  0xc2   : > { %v356_v22 = vmax.f32 %v354_v19, %v355_v21 }
  0xc3   : > { %v348_v23 = vrot.slane %v347_v20, 4 }
  0xc4   : > { %v357_v24 = vrot.slane %v356_v22, 4 }
  0xc5   : > { %v349_v25 = vmax.f32 %v347_v20, %v348_v23 }
  0xc6   : > { %v358_v26 = vmax.f32 %v356_v22, %v357_v24 }
  0xc7   : > { %v350_v27 = vrot.slane %v349_v25, 2 }
  0xc8   : > { %v359_v28 = vrot.slane %v358_v26, 2 }
  0xc9   : > { %v351_v29 = vmax.f32 %v349_v25, %v350_v27 }
  0xca   : > { %v360_v30 = vmax.f32 %v358_v26, %v359_v28 }
  0xcb   : > { %v352_v31 = vrot.slane %v351_v29, 1 }
  0xcc   : > { %v361_v32 = vrot.slane %v360_v30, 1 }
  0xcd   : > { %v353_v33 = vmax.f32 %v351_v29, %v352_v31 }
  0xce   : > { %v362_v34 = vmax.f32 %v360_v30, %v361_v32 }
  0xcf   : > { %v364_v35 = vsub.f32 %v739_v15, %v353_v33  ;;  %v363_v36 = vsub.f32 %v735_v13, %v353_v33 }
  0xd0   : > { %v366_v37 = vsub.f32 %v741_v16, %v362_v34  ;;  %v365_v38 = vsub.f32 %v737_v14, %v362_v34 }
  0xd1   : > { %v369_v39 = vmul.f32 1.442695, %v364_v35  ;;  %v367_v42 = vmul.f32 1.442695, %v363_v36 }
  0xd2   : > { %v373_v40 = vmul.f32 1.442695, %v366_v37  ;;  %v371_v41 = vmul.f32 1.442695, %v365_v38 }
  0xd3   : > { %742 = vpow2.f32 %v369_v39 }
  0xd4   : > { %744 = vpow2.f32 %v373_v40 }
  0xd5   : > { %746 = vpow2.f32 %v371_v41 }
  0xd6   : > { %748 = vpow2.f32 %v367_v42 }
  0xd9   : > { %v743_v43 = vpop.eup %742 }
  0xda   : > { %v745_v44 = vpop.eup %744  ;;  %v376_v46 = vsel %vm344_vm1, %v743_v43, 0.0 }
  0xdb   : > { %v747_v45 = vpop.eup %746  ;;  %v385_v47 = vsel %vm344_vm1, %v745_v44, 0.0 }
  0xdc   : > { %v749_v48 = vpop.eup %748  ;;  %v384_v49 = vsel %vm344_vm1, %v747_v45, 0.0 }
  0xdd   : > { %v386_v50 = vadd.f32 %v385_v47, %v384_v49  ;;  %v375_v51 = vsel %vm344_vm1, %v749_v48, 0.0 }
  0xde   : > { %v377_v52 = vadd.f32 %v376_v46, %v375_v51 }
  0xdf   : > { %v387_v53 = vrot.slane %v386_v50, 4 }
  0xe0   : > { %v378_v54 = vrot.slane %v377_v52, 4 }
  0xe1   : > { %v388_v55 = vadd.f32 %v387_v53, %v386_v50 }
  0xe2   : > { %v379_v56 = vadd.f32 %v378_v54, %v377_v52 }
  0xe3   : > { %v389_v57 = vrot.slane %v388_v55, 2 }
  0xe4   : > { %v380_v58 = vrot.slane %v379_v56, 2 }
  0xe5   : > { %v390_v59 = vadd.f32 %v389_v57, %v388_v55 }
  0xe6   : > { %v381_v60 = vadd.f32 %v380_v58, %v379_v56 }
  0xe7   : > { %v391_v61 = vrot.slane %v390_v59, 1 }
  0xe8   : > { %v382_v62 = vrot.slane %v381_v60, 1 }
  0xe9   : > { %v392_v63 = vadd.f32 %v391_v61, %v390_v59 }
  0xea   : > { %v383_v0 = vadd.f32 %v382_v62, %v381_v60 }
  0xeb   : > { %750 = vrcp.f32 %v392_v63  ;;  %v420_v6 = vand.u32 2147483648, %v392_v63  ;;  %v418_v9 = vand.u32 2147483647, %v392_v63  ;;  %vm414_vm4 = vweird.f32 %v392_v63 }
  0xec   : > { %752 = vrcp.f32 %v383_v0  ;;  %v404_v10 = vand.u32 2147483648, %v383_v0  ;;  %v402_v12 = vand.u32 2147483647, %v383_v0  ;;  %vm398_vm6 = vweird.f32 %v383_v0 }
  0xed   : > { %v421_v14 = vor.u32 1.1754944e-38, %v420_v6  ;;  %vm419_vm7 = vcmp.eq.f32.partialorder %v418_v9, 8.507059e+37 }
  0xee   : > { %v405_v17 = vor.u32 1.1754944e-38, %v404_v10  ;;  %vm403_vm9 = vcmp.eq.f32.partialorder %v402_v12, 8.507059e+37 }
  0xf1   : > { %v751_v1 = vpop.eup %750 }
  0xf2   : > { %v753_v2 = vpop.eup %752  ;;  %v410_v3 = vmul.f32 %v751_v1, %v392_v63  ;;  %vm415_vm2 = vweird.f32 %v751_v1 }
  0xf3   : > { %v394_v4 = vmul.f32 %v753_v2, %v383_v0  ;;  %vm399_vm3 = vweird.f32 %v753_v2  ;;  %vm416_vm5 = vmor %vm414_vm4, %vm415_vm2 }
  0xf4   : > { %v411_v5 = vsub.f32 1.0, %v410_v3  ;;  %vm400_vm8 = vmor %vm398_vm6, %vm399_vm3 }
  0xf5   : > { %v395_v7 = vsub.f32 1.0, %v394_v4 }
  0xf6   : > { %v412_v8 = vmul.f32 %v751_v1, %v411_v5 }
  0xf7   : > { %v396_v11 = vmul.f32 %v753_v2, %v395_v7 }
  0xf8   : > { %v413_v13 = vadd.f32 %v751_v1, %v412_v8 }
  0xf9   : > { %v397_v15 = vadd.f32 %v753_v2, %v396_v11 }
  0xfa   : > { %v417_v16 = vsel %vm416_vm5, %v751_v1, %v413_v13 }
  0xfb   : > { %v422_v18 = vsel %vm419_vm7, %v421_v14, %v417_v16  ;;  %v401_v19 = vsel %vm400_vm8, %v753_v2, %v397_v15 }
  0xfc   : > { %v423_v20 = vmul.f32 %v747_v45, %v422_v18  ;;  %v406_v21 = vsel %vm403_vm9, %v405_v17, %v401_v19  ;;  %v424_v24 = vmul.f32 %v745_v44, %v422_v18 }
  0xfd   : > { %v407_v22 = vmul.f32 %v749_v48, %v406_v21  ;;  %v408_v23 = vmul.f32 %v743_v43, %v406_v21 }
  0xfe   : > { %468 = vst.msk [vmem:[%s270_s11 + $0x10] sm:$0xff] %vm344_vm1, %v423_v20 }
  0xff   : > { %466 = vst.msk [vmem:[%s270_s11] sm:$0xff] %vm344_vm1, %v407_v22 }
 0x100   : > { %467 = vst.msk [vmem:[%s270_s11 + $0x8] sm:$0xff] %vm344_vm1, %v408_v23 }
 0x101   : > { %469 = vst.msk [vmem:[%s270_s11 + $0x18] sm:$0xff] %vm344_vm1, %v424_v24  ;;  %s804_s11 = scalar_lea.hbm %s1062_s3, 8 }
 0x102   : > { %p806_p3 = scmp.lt.s32.totalorder %s804_s11, %s800_s22 }
 0x104   : > { %p807_p4 = por %p806_p3, %p805_p2 }
 0x106   : > { %p808_p5 = pnand %p807_p4, %p803_p0 }
 0x123   : > { %v434_v25 = vpop.permute.xlu1 %433  ;;  %v430_v26 = vpop.permute.xlu0 %429 }
 0x124   : > { %470 = vst.msk [vmem:[%s277_s25] sm:$0xff] %vm344_vm1, %v430_v26  ;;  %v443_v27 = vmul.f32 %v434_v25, %v423_v20  ;;  %v441_v28 = vmul.f32 %v430_v26, %v407_v22 }
 0x125   : > { %472 = vst.msk [vmem:[%s277_s25 + $0x10] sm:$0xff] %vm344_vm1, %v434_v25 }
 0x126   : > { %v454_v33 = vsel %vm344_vm1, %v443_v27, 0.0  ;;  %v445_v34 = vsel %vm344_vm1, %v441_v28, 0.0 }
 0x12b   : > { %v436_v29 = vpop.permute.xlu1 %435  ;;  %v432_v30 = vpop.permute.xlu0 %431 }
 0x12c   : > { %v444_v31 = vmul.f32 %v436_v29, %v424_v24  ;;  %v442_v32 = vmul.f32 %v432_v30, %v408_v23  ;;  %471 = vst.msk [vmem:[%s277_s25 + $0x8] sm:$0xff] %vm344_vm1, %v432_v30 }
 0x12d   : > { %473 = vst.msk [vmem:[%s277_s25 + $0x18] sm:$0xff] %vm344_vm1, %v436_v29 }
 0x12e   : > { %v455_v35 = vsel %vm344_vm1, %v444_v31, 0.0  ;;  %v446_v36 = vsel %vm344_vm1, %v442_v32, 0.0 }
 0x12f   : > { %v456_v37 = vadd.f32 %v455_v35, %v454_v33  ;;  %v447_v38 = vadd.f32 %v446_v36, %v445_v34 }
 0x131   : > { %v457_v39 = vrot.slane %v456_v37, 4  ;;  %v448_v40 = vrot.slane %v447_v38, 4 }
 0x133   : > { %v458_v41 = vadd.f32 %v457_v39, %v456_v37  ;;  %v449_v42 = vadd.f32 %v448_v40, %v447_v38 }
 0x135   : > { %v459_v43 = vrot.slane %v458_v41, 2  ;;  %v450_v44 = vrot.slane %v449_v42, 2 }
 0x137   : > { %v460_v45 = vadd.f32 %v459_v43, %v458_v41  ;;  %v451_v46 = vadd.f32 %v450_v44, %v449_v42 }
 0x139   : > { %v461_v47 = vrot.slane %v460_v45, 1  ;;  %v452_v48 = vrot.slane %v451_v46, 1 }
 0x13b   : > { %v462_v49 = vadd.f32 %v461_v47, %v460_v45  ;;  %v453_v50 = vadd.f32 %v452_v48, %v451_v46 }
 0x13d   : > { %464 = vst.msk [vmem:[%s246_s29] sm:$0x1] %vm463_vm10, %v453_v50 }
 0x13e   : > { %465 = vst.msk [vmem:[%s246_s29 + $0x1] sm:$0x1] %vm463_vm10, %v462_v49 }
 0x13f   : > { %811 = shalt.err (!%p808_p5)
}
 0x140   : > { %s855_s12 = smov 16   ;;  %s856_s25 = smov 1  }
 0x141   : > { %684 = dma.vmem_to_hbm [thread:$0]  (%p936_p10), %s499_s8, 32, %s501_s26, %s475_s28, %s855_s12, %s855_s12, %s856_s25  }
 0x142 PF: > { %p695_p7 = scmp.ge.s32.totalorder %s850_s21, 2  ;;  %s523_s16 = sand.u32 1, %s838_s18  }
 0x143   : > { %s524_s13 = scalar_lea.sflag [#allocation4], %s523_s16 }
 0x144   : > { %p691_p8 = pnand %p695_p7, %p940_p11 }
 0x146   : > { %p692_p9 = pneg %p691_p8 }
 0x148   : > { %833 = dma.done.wait (%p692_p9), %s524_s13, 32  }
 0x149   : > { %835 = vsyncadd (%p692_p9), %s524_s13, 4294967264  ;;  %p19_p1 = scmp.ge.s32.totalorder %s912_s24, 6   ;;  %s1070_s18 = smov %s842_s19 }
 0x14a   : > { %s1071_s19 = smov %s846_s20  ;;  %s1072_s20 = smov %s924_s27 }
 0x14b   : > { %s1073_s21 = smov %s912_s24  ;;  %21 = sbr.rel (!%p19_p1) target bundleno = 5 (0x5), region = 101 }
 0x150   :  { %548 = vsyncpa [#allocation3], 1 }
 0x151   :  { %550 = vsyncpa [#allocation3 + $0x1], 1 }
 0x152   :  { %551 = vsyncpa [#allocation4], 1 }
 0x153   :  { %553 = vsyncpa [#allocation4 + $0x1], 1 }

</bundles_post_ra>
